<compile_context>
chip_gen: v5e
topology: v5e:2x2
jax: 0.10.0
libtpu: 0.0.40
codegen_flags: <defaults>
</compile_context>

<pallas_src>
import jax
import jax.numpy as jnp
from jax.experimental import pallas as pl
from jax.experimental.pallas import tpu as pltpu

CONTEXT_SIZE = 2
EMBEDDING_DIM = 10
EMB_PAD = 16          # pad 10 -> 16 so the layer-1 contraction dim (32) is sublane friendly
HIDDEN = 128
VOCAB_SIZE = 128
LANE = 128
SUBLANE = 8


def _round_up(x, m):
    return (x + m - 1) // m * m


def ngram_kernel(idx_ref, emb_ref, w1_ref, b1_ref, w2_ref, b2_ref, out_ref, x_vmem):
    """One (vocab-block j, batch-block b) step of the fused n-gram forward.

    idx_ref : SMEM (b_pad*CONTEXT_SIZE,) int32 token ids (whole batch)
    emb_ref : VMEM (vocab, EMB_PAD) f32 padded embedding table (resident)
    w1_ref  : VMEM (CONTEXT_SIZE*EMB_PAD, HIDDEN) re-packed layer-1 weight (resident)
    b1_ref  : VMEM (1, HIDDEN) f32
    w2_ref  : VMEM (HIDDEN, TN) vocab block of layer-2 weight (streamed)
    b2_ref  : VMEM (1, TN) f32 vocab block of layer-2 bias
    out_ref : VMEM (BM, TN) f32 output block
    x_vmem  : VMEM (BM, CONTEXT_SIZE*EMB_PAD) f32 packed layer-1 LHS scratch
    """
    bm = out_ref.shape[0]
    b0 = pl.program_id(1) * bm            # first batch row handled by this block

    def gather_row(r):
        # Pack the CONTEXT_SIZE embedding rows of batch row (b0 + r) into the LHS.
        for c in range(CONTEXT_SIZE):
            tok = idx_ref[(b0 + r) * CONTEXT_SIZE + c]          # scalar read from SMEM
            x_vmem[pl.ds(r, 1), c * EMB_PAD:(c + 1) * EMB_PAD] = emb_ref[pl.ds(tok, 1), :]

    if bm * CONTEXT_SIZE <= 32:           # small tiles: unroll for LLO visibility
        for r in range(bm):
            gather_row(r)
    else:                                 # large batch tiles: keep code size bounded
        pl.loop(0, bm)(gather_row)

    # Layer 1: one fused (BM, 32) @ (32, 128) dot; bias + ReLU on the VPU in f32.
    x = x_vmem[...]
    h = jnp.dot(x.astype(w1_ref.dtype), w1_ref[...],
                preferred_element_type=jnp.float32) + b1_ref[...]
    h = jnp.maximum(h, 0.0)

    # Layer 2: (BM, 128) @ (128, TN) vocab block, f32 accumulation, lane-dense store.
    out = jnp.dot(h.astype(w2_ref.dtype), w2_ref[...],
                  preferred_element_type=jnp.float32) + b2_ref[...]
    out_ref[...] = out.astype(out_ref.dtype)


def prepare_params(embed_table, w1, b1, w2, b2, weight_dtype=jnp.float32):
    """One-time parameter prep (hoisted out of the forward path).

    Weights follow y = x @ W + b layout, i.e. w1: (CONTEXT_SIZE*EMBEDDING_DIM, 128),
    w2: (128, vocab) (transposed nn.Linear weights).
    """
    vocab, n_dim = embed_table.shape
    assert n_dim == EMBEDDING_DIM
    hidden = w1.shape[1]
    v_pad = _round_up(vocab, LANE)

    # Embedding feature dim padded 10 -> 16 (kept f32; it is a tiny fraction of traffic).
    emb_pad = jnp.zeros((vocab, EMB_PAD), jnp.float32).at[:, :n_dim].set(
        embed_table.astype(jnp.float32))

    # Re-pack W1 rows to line up with the padded/packed LHS layout (zero pad rows).
    w1_pad = jnp.zeros((CONTEXT_SIZE * EMB_PAD, hidden), weight_dtype)
    for c in range(CONTEXT_SIZE):
        w1_pad = w1_pad.at[c * EMB_PAD:c * EMB_PAD + n_dim].set(
            w1[c * n_dim:(c + 1) * n_dim].astype(weight_dtype))

    # Pad vocab (W2 / output lane dim) to a multiple of 128 for lane-dense stores.
    w2_pad = jnp.zeros((hidden, v_pad), weight_dtype).at[:, :vocab].set(
        w2.astype(weight_dtype))
    b1_2d = b1.reshape(1, hidden).astype(jnp.float32)
    b2_pad = jnp.zeros((1, v_pad), jnp.float32).at[:, :vocab].set(
        b2.reshape(1, -1).astype(jnp.float32))

    return {"emb": emb_pad, "w1": w1_pad, "b1": b1_2d,
            "w2": w2_pad, "b2": b2_pad, "vocab": vocab}


def n_gram_forward(idx, params, *, tn=512, bm_max=128):
    """Forward pass of the n_gram module.

    idx: (CONTEXT_SIZE,) int  -> returns (1, vocab)   (original module semantics)
         (B, CONTEXT_SIZE)    -> returns (B, vocab)   (batched contexts)
    params: output of prepare_params().
    """
    emb, w1, b1, w2, b2 = params["emb"], params["w1"], params["b1"], params["w2"], params["b2"]
    vocab = params["vocab"]
    hidden, v_pad = w2.shape
    k1 = w1.shape[0]
    n_emb_pad = emb.shape[1]
    wbytes = jnp.dtype(w2.dtype).itemsize
    f32 = 4

    idx2 = jnp.atleast_2d(idx)
    batch = idx2.shape[0]
    # int32 + bounds clamp (TPU has no runtime OOB check on VMEM refs).
    idx2 = jnp.clip(idx2.astype(jnp.int32), 0, vocab - 1)

    # Batch tile (MXU M dim): multiple of 8, up to bm_max rows per block.
    bm = min(_round_up(batch, SUBLANE), bm_max)
    b_pad = _round_up(batch, bm)
    idx_pad = jnp.zeros((b_pad, CONTEXT_SIZE), jnp.int32).at[:batch].set(idx2)
    idx_flat = idx_pad.reshape(-1)        # 1-D SMEM array avoids 2-D SMEM padding

    # Vocab tile (lane dim): multiple of 128 that divides v_pad.
    tn = min(_round_up(tn, LANE), v_pad)
    while v_pad % tn:
        tn -= LANE
    nj, nb = v_pad // tn, b_pad // bm     # grid: vocab outer, batch inner (W2 reuse)

    # VMEM budget from the actual blocks (conservative: small lane dims padded to 128),
    # floored at the 32 MiB scoped default and capped at v7x's 64 MiB physical VMEM.
    vmem_needed = (
        vocab * max(n_emb_pad, LANE) * f32          # resident embedding table
        + k1 * hidden * wbytes + LANE * f32         # W1 + b1 (resident)
        + 2 * hidden * tn * wbytes                  # double-buffered W2 block
        + 2 * tn * f32                              # double-buffered b2 block
        + 2 * bm * tn * f32                         # double-buffered out block
        + bm * LANE * f32                           # packed-LHS scratch
        + (4 << 20))                                # headroom
    vmem_limit = int(min(max(vmem_needed, 32 << 20), 64 << 20))

    cost = pl.CostEstimate(
        flops=2 * b_pad * (k1 * hidden + hidden * v_pad),
        transcendentals=0,
        bytes_accessed=int(idx_flat.size * 4 + vocab * n_emb_pad * f32
                           + k1 * hidden * wbytes + hidden * f32
                           + hidden * v_pad * wbytes + v_pad * f32
                           + b_pad * v_pad * f32))

    out = pl.pallas_call(
        ngram_kernel,
        out_shape=jax.ShapeDtypeStruct((b_pad, v_pad), jnp.float32),
        grid=(nj, nb),
        in_specs=[
            pl.BlockSpec(memory_space=pltpu.MemorySpace.SMEM),        # token ids
            pl.BlockSpec((vocab, n_emb_pad), lambda j, b: (0, 0)),    # embedding table (resident)
            pl.BlockSpec((k1, hidden), lambda j, b: (0, 0)),          # W1 (resident)
            pl.BlockSpec((1, hidden), lambda j, b: (0, 0)),           # b1
            pl.BlockSpec((hidden, tn), lambda j, b: (0, j)),          # W2 vocab block (streamed)
            pl.BlockSpec((1, tn), lambda j, b: (0, j)),               # b2 vocab block
        ],
        out_specs=pl.BlockSpec((bm, tn), lambda j, b: (b, j)),
        scratch_shapes=[pltpu.VMEM((bm, k1), jnp.float32)],
        compiler_params=pltpu.CompilerParams(
            dimension_semantics=("parallel", "parallel"),
            vmem_limit_bytes=vmem_limit),
        cost_estimate=cost,
    )(idx_flat, emb, w1, b1, w2, b2)

    return out[:batch, :vocab]


def reference_forward(idx, embed_table, w1, b1, w2, b2):
    idx2 = jnp.atleast_2d(idx)
    emb = embed_table[idx2]                      # (B, C, n_dim)
    x = emb.reshape(idx2.shape[0], -1)           # (B, C*n_dim)
    h = jnp.maximum(x @ w1 + b1.reshape(1, -1), 0.0)
    return h @ w2 + b2.reshape(1, -1)


if __name__ == "__main__":
    key = jax.random.PRNGKey(0)
    k_emb, k_w1, k_b1, k_w2, k_b2, k_idx = jax.random.split(key, 6)

    embed_table = jax.random.normal(k_emb, (VOCAB_SIZE, EMBEDDING_DIM), jnp.float32) * 0.1
    w1 = jax.random.normal(k_w1, (CONTEXT_SIZE * EMBEDDING_DIM, HIDDEN), jnp.float32) * 0.1
    b1 = jax.random.normal(k_b1, (HIDDEN,), jnp.float32) * 0.1
    w2 = jax.random.normal(k_w2, (HIDDEN, VOCAB_SIZE), jnp.float32) * 0.1
    b2 = jax.random.normal(k_b2, (VOCAB_SIZE,), jnp.float32) * 0.1

    # One-time parameter prep (hoisted out of the per-call path).
    params_f32 = prepare_params(embed_table, w1, b1, w2, b2)

    # Batched contexts: (B, CONTEXT_SIZE) token ids (batch is padded to 8 internally).
    BATCH = 5
    idx_batch = jax.random.randint(k_idx, (BATCH, CONTEXT_SIZE), 0, VOCAB_SIZE, jnp.int32)

    out_b = jax.block_until_ready(n_gram_forward(idx_batch, params_f32))
    ref_b = reference_forward(idx_batch, embed_table, w1, b1, w2, b2)
    assert out_b.shape == (BATCH, VOCAB_SIZE), out_b.shape
    assert jnp.allclose(out_b, ref_b, atol=1e-4, rtol=1e-4), "batched mismatch vs reference"

    # Original single-context semantics: (CONTEXT_SIZE,) -> (1, vocab).
    idx_single = idx_batch[0]
    out_s = jax.block_until_ready(n_gram_forward(idx_single, params_f32))
    ref_s = reference_forward(idx_single, embed_table, w1, b1, w2, b2)
    assert out_s.shape == (1, VOCAB_SIZE), out_s.shape
    assert jnp.allclose(out_s, ref_s, atol=1e-4, rtol=1e-4), "single-context mismatch vs reference"

    # Optional bf16 weights (halves HBM bytes on the dominant W2 stream); activations,
    # bias add and accumulation stay f32 so only a looser tolerance is needed.
    params_bf16 = prepare_params(embed_table, w1, b1, w2, b2, weight_dtype=jnp.bfloat16)
    out_bf = jax.block_until_ready(n_gram_forward(idx_batch, params_bf16))
    assert out_bf.shape == (BATCH, VOCAB_SIZE), out_bf.shape
    assert jnp.allclose(out_bf, ref_b, atol=2e-2, rtol=2e-2), "bf16-weight mismatch vs reference"

    print("KERNEL_OK")
</pallas_src>

<mosaic_0001>
module attributes {stable_mosaic.version = 11 : i64} {
  func.func @ngram_kernel(%arg0: i32, %arg1: i32, %arg2: memref<16xi32, #tpu.memory_space<smem>>, %arg3: memref<128x16xf32, #tpu.memory_space<vmem>>, %arg4: memref<32x128xf32, #tpu.memory_space<vmem>>, %arg5: memref<1x128xf32, #tpu.memory_space<vmem>>, %arg6: memref<128x128xf32, #tpu.memory_space<vmem>>, %arg7: memref<1x128xf32, #tpu.memory_space<vmem>>, %arg8: memref<8x128xf32, #tpu.memory_space<vmem>>, %arg9: memref<8x32xf32, #tpu.memory_space<vmem>>) attributes {dimension_semantics = [#tpu.dimension_semantics<parallel>, #tpu.dimension_semantics<parallel>], iteration_bounds = array<i64: 1, 1>, scalar_prefetch = 0 : i64, scratch_operands = 1 : i64, tpu.core_type = #tpu.core_type<tc>, window_params = [{transform_indices = @transform_0, window_bounds = array<i64: 16>}, {pipeline_mode = #tpu.pipeline_mode<synchronous>, transform_indices = @transform_1, window_bounds = array<i64: 128, 16>}, {pipeline_mode = #tpu.pipeline_mode<synchronous>, transform_indices = @transform_2, window_bounds = array<i64: 32, 128>}, {pipeline_mode = #tpu.pipeline_mode<synchronous>, transform_indices = @transform_3, window_bounds = array<i64: 1, 128>}, {transform_indices = @transform_4, window_bounds = array<i64: 128, 128>}, {transform_indices = @transform_5, window_bounds = array<i64: 1, 128>}, {transform_indices = @transform_6, window_bounds = array<i64: 8, 128>}]} {
    %c8_i32 = arith.constant 8 : i32
    %0 = arith.muli %arg1, %c8_i32 : i32
    %c0_i32 = arith.constant 0 : i32
    %1 = arith.addi %0, %c0_i32 : i32
    %c2_i32 = arith.constant 2 : i32
    %2 = arith.muli %1, %c2_i32 : i32
    %c0_i32_0 = arith.constant 0 : i32
    %3 = arith.addi %2, %c0_i32_0 : i32
    %4 = arith.index_cast %3 : i32 to index
    %5 = memref.load %arg2[%4] : memref<16xi32, #tpu.memory_space<smem>>
    %6 = arith.index_cast %5 : i32 to index
    %c0 = arith.constant 0 : index
    %7 = vector.load %arg3[%6, %c0] : memref<128x16xf32, #tpu.memory_space<vmem>>, vector<1x16xf32>
    %c0_1 = arith.constant 0 : index
    %c0_2 = arith.constant 0 : index
    %8 = vector.load %arg9[%c0_1, %c0_2] : memref<8x32xf32, #tpu.memory_space<vmem>>, vector<1x16xf32>
    tpu.vector_store %arg9[%c0_1, %c0_2], %7 {strides = array<i32>} : memref<8x32xf32, #tpu.memory_space<vmem>>, vector<1x16xf32>,
    %c0_i32_3 = arith.constant 0 : i32
    %9 = arith.addi %0, %c0_i32_3 : i32
    %c2_i32_4 = arith.constant 2 : i32
    %10 = arith.muli %9, %c2_i32_4 : i32
    %c1_i32 = arith.constant 1 : i32
    %11 = arith.addi %10, %c1_i32 : i32
    %12 = arith.index_cast %11 : i32 to index
    %13 = memref.load %arg2[%12] : memref<16xi32, #tpu.memory_space<smem>>
    %14 = arith.index_cast %13 : i32 to index
    %c0_5 = arith.constant 0 : index
    %15 = vector.load %arg3[%14, %c0_5] : memref<128x16xf32, #tpu.memory_space<vmem>>, vector<1x16xf32>
    %c0_6 = arith.constant 0 : index
    %c16 = arith.constant 16 : index
    %16 = vector.load %arg9[%c0_6, %c16] : memref<8x32xf32, #tpu.memory_space<vmem>>, vector<1x16xf32>
    tpu.vector_store %arg9[%c0_6, %c16], %15 {strides = array<i32>} : memref<8x32xf32, #tpu.memory_space<vmem>>, vector<1x16xf32>,
    %c1_i32_7 = arith.constant 1 : i32
    %17 = arith.addi %0, %c1_i32_7 : i32
    %c2_i32_8 = arith.constant 2 : i32
    %18 = arith.muli %17, %c2_i32_8 : i32
    %c0_i32_9 = arith.constant 0 : i32
    %19 = arith.addi %18, %c0_i32_9 : i32
    %20 = arith.index_cast %19 : i32 to index
    %21 = memref.load %arg2[%20] : memref<16xi32, #tpu.memory_space<smem>>
    %22 = arith.index_cast %21 : i32 to index
    %c0_10 = arith.constant 0 : index
    %23 = vector.load %arg3[%22, %c0_10] : memref<128x16xf32, #tpu.memory_space<vmem>>, vector<1x16xf32>
    %c1 = arith.constant 1 : index
    %c0_11 = arith.constant 0 : index
    %24 = vector.load %arg9[%c1, %c0_11] : memref<8x32xf32, #tpu.memory_space<vmem>>, vector<1x16xf32>
    tpu.vector_store %arg9[%c1, %c0_11], %23 {strides = array<i32>} : memref<8x32xf32, #tpu.memory_space<vmem>>, vector<1x16xf32>,
    %c1_i32_12 = arith.constant 1 : i32
    %25 = arith.addi %0, %c1_i32_12 : i32
    %c2_i32_13 = arith.constant 2 : i32
    %26 = arith.muli %25, %c2_i32_13 : i32
    %c1_i32_14 = arith.constant 1 : i32
    %27 = arith.addi %26, %c1_i32_14 : i32
    %28 = arith.index_cast %27 : i32 to index
    %29 = memref.load %arg2[%28] : memref<16xi32, #tpu.memory_space<smem>>
    %30 = arith.index_cast %29 : i32 to index
    %c0_15 = arith.constant 0 : index
    %31 = vector.load %arg3[%30, %c0_15] : memref<128x16xf32, #tpu.memory_space<vmem>>, vector<1x16xf32>
    %c1_16 = arith.constant 1 : index
    %c16_17 = arith.constant 16 : index
    %32 = vector.load %arg9[%c1_16, %c16_17] : memref<8x32xf32, #tpu.memory_space<vmem>>, vector<1x16xf32>
    tpu.vector_store %arg9[%c1_16, %c16_17], %31 {strides = array<i32>} : memref<8x32xf32, #tpu.memory_space<vmem>>, vector<1x16xf32>,
    %c2_i32_18 = arith.constant 2 : i32
    %33 = arith.addi %0, %c2_i32_18 : i32
    %c2_i32_19 = arith.constant 2 : i32
    %34 = arith.muli %33, %c2_i32_19 : i32
    %c0_i32_20 = arith.constant 0 : i32
    %35 = arith.addi %34, %c0_i32_20 : i32
    %36 = arith.index_cast %35 : i32 to index
    %37 = memref.load %arg2[%36] : memref<16xi32, #tpu.memory_space<smem>>
    %38 = arith.index_cast %37 : i32 to index
    %c0_21 = arith.constant 0 : index
    %39 = vector.load %arg3[%38, %c0_21] : memref<128x16xf32, #tpu.memory_space<vmem>>, vector<1x16xf32>
    %c2 = arith.constant 2 : index
    %c0_22 = arith.constant 0 : index
    %40 = vector.load %arg9[%c2, %c0_22] : memref<8x32xf32, #tpu.memory_space<vmem>>, vector<1x16xf32>
    tpu.vector_store %arg9[%c2, %c0_22], %39 {strides = array<i32>} : memref<8x32xf32, #tpu.memory_space<vmem>>, vector<1x16xf32>,
    %c2_i32_23 = arith.constant 2 : i32
    %41 = arith.addi %0, %c2_i32_23 : i32
    %c2_i32_24 = arith.constant 2 : i32
    %42 = arith.muli %41, %c2_i32_24 : i32
    %c1_i32_25 = arith.constant 1 : i32
    %43 = arith.addi %42, %c1_i32_25 : i32
    %44 = arith.index_cast %43 : i32 to index
    %45 = memref.load %arg2[%44] : memref<16xi32, #tpu.memory_space<smem>>
    %46 = arith.index_cast %45 : i32 to index
    %c0_26 = arith.constant 0 : index
    %47 = vector.load %arg3[%46, %c0_26] : memref<128x16xf32, #tpu.memory_space<vmem>>, vector<1x16xf32>
    %c2_27 = arith.constant 2 : index
    %c16_28 = arith.constant 16 : index
    %48 = vector.load %arg9[%c2_27, %c16_28] : memref<8x32xf32, #tpu.memory_space<vmem>>, vector<1x16xf32>
    tpu.vector_store %arg9[%c2_27, %c16_28], %47 {strides = array<i32>} : memref<8x32xf32, #tpu.memory_space<vmem>>, vector<1x16xf32>,
    %c3_i32 = arith.constant 3 : i32
    %49 = arith.addi %0, %c3_i32 : i32
    %c2_i32_29 = arith.constant 2 : i32
    %50 = arith.muli %49, %c2_i32_29 : i32
    %c0_i32_30 = arith.constant 0 : i32
    %51 = arith.addi %50, %c0_i32_30 : i32
    %52 = arith.index_cast %51 : i32 to index
    %53 = memref.load %arg2[%52] : memref<16xi32, #tpu.memory_space<smem>>
    %54 = arith.index_cast %53 : i32 to index
    %c0_31 = arith.constant 0 : index
    %55 = vector.load %arg3[%54, %c0_31] : memref<128x16xf32, #tpu.memory_space<vmem>>, vector<1x16xf32>
    %c3 = arith.constant 3 : index
    %c0_32 = arith.constant 0 : index
    %56 = vector.load %arg9[%c3, %c0_32] : memref<8x32xf32, #tpu.memory_space<vmem>>, vector<1x16xf32>
    tpu.vector_store %arg9[%c3, %c0_32], %55 {strides = array<i32>} : memref<8x32xf32, #tpu.memory_space<vmem>>, vector<1x16xf32>,
    %c3_i32_33 = arith.constant 3 : i32
    %57 = arith.addi %0, %c3_i32_33 : i32
    %c2_i32_34 = arith.constant 2 : i32
    %58 = arith.muli %57, %c2_i32_34 : i32
    %c1_i32_35 = arith.constant 1 : i32
    %59 = arith.addi %58, %c1_i32_35 : i32
    %60 = arith.index_cast %59 : i32 to index
    %61 = memref.load %arg2[%60] : memref<16xi32, #tpu.memory_space<smem>>
    %62 = arith.index_cast %61 : i32 to index
    %c0_36 = arith.constant 0 : index
    %63 = vector.load %arg3[%62, %c0_36] : memref<128x16xf32, #tpu.memory_space<vmem>>, vector<1x16xf32>
    %c3_37 = arith.constant 3 : index
    %c16_38 = arith.constant 16 : index
    %64 = vector.load %arg9[%c3_37, %c16_38] : memref<8x32xf32, #tpu.memory_space<vmem>>, vector<1x16xf32>
    tpu.vector_store %arg9[%c3_37, %c16_38], %63 {strides = array<i32>} : memref<8x32xf32, #tpu.memory_space<vmem>>, vector<1x16xf32>,
    %c4_i32 = arith.constant 4 : i32
    %65 = arith.addi %0, %c4_i32 : i32
    %c2_i32_39 = arith.constant 2 : i32
    %66 = arith.muli %65, %c2_i32_39 : i32
    %c0_i32_40 = arith.constant 0 : i32
    %67 = arith.addi %66, %c0_i32_40 : i32
    %68 = arith.index_cast %67 : i32 to index
    %69 = memref.load %arg2[%68] : memref<16xi32, #tpu.memory_space<smem>>
    %70 = arith.index_cast %69 : i32 to index
    %c0_41 = arith.constant 0 : index
    %71 = vector.load %arg3[%70, %c0_41] : memref<128x16xf32, #tpu.memory_space<vmem>>, vector<1x16xf32>
    %c4 = arith.constant 4 : index
    %c0_42 = arith.constant 0 : index
    %72 = vector.load %arg9[%c4, %c0_42] : memref<8x32xf32, #tpu.memory_space<vmem>>, vector<1x16xf32>
    tpu.vector_store %arg9[%c4, %c0_42], %71 {strides = array<i32>} : memref<8x32xf32, #tpu.memory_space<vmem>>, vector<1x16xf32>,
    %c4_i32_43 = arith.constant 4 : i32
    %73 = arith.addi %0, %c4_i32_43 : i32
    %c2_i32_44 = arith.constant 2 : i32
    %74 = arith.muli %73, %c2_i32_44 : i32
    %c1_i32_45 = arith.constant 1 : i32
    %75 = arith.addi %74, %c1_i32_45 : i32
    %76 = arith.index_cast %75 : i32 to index
    %77 = memref.load %arg2[%76] : memref<16xi32, #tpu.memory_space<smem>>
    %78 = arith.index_cast %77 : i32 to index
    %c0_46 = arith.constant 0 : index
    %79 = vector.load %arg3[%78, %c0_46] : memref<128x16xf32, #tpu.memory_space<vmem>>, vector<1x16xf32>
    %c4_47 = arith.constant 4 : index
    %c16_48 = arith.constant 16 : index
    %80 = vector.load %arg9[%c4_47, %c16_48] : memref<8x32xf32, #tpu.memory_space<vmem>>, vector<1x16xf32>
    tpu.vector_store %arg9[%c4_47, %c16_48], %79 {strides = array<i32>} : memref<8x32xf32, #tpu.memory_space<vmem>>, vector<1x16xf32>,
    %c5_i32 = arith.constant 5 : i32
    %81 = arith.addi %0, %c5_i32 : i32
    %c2_i32_49 = arith.constant 2 : i32
    %82 = arith.muli %81, %c2_i32_49 : i32
    %c0_i32_50 = arith.constant 0 : i32
    %83 = arith.addi %82, %c0_i32_50 : i32
    %84 = arith.index_cast %83 : i32 to index
    %85 = memref.load %arg2[%84] : memref<16xi32, #tpu.memory_space<smem>>
    %86 = arith.index_cast %85 : i32 to index
    %c0_51 = arith.constant 0 : index
    %87 = vector.load %arg3[%86, %c0_51] : memref<128x16xf32, #tpu.memory_space<vmem>>, vector<1x16xf32>
    %c5 = arith.constant 5 : index
    %c0_52 = arith.constant 0 : index
    %88 = vector.load %arg9[%c5, %c0_52] : memref<8x32xf32, #tpu.memory_space<vmem>>, vector<1x16xf32>
    tpu.vector_store %arg9[%c5, %c0_52], %87 {strides = array<i32>} : memref<8x32xf32, #tpu.memory_space<vmem>>, vector<1x16xf32>,
    %c5_i32_53 = arith.constant 5 : i32
    %89 = arith.addi %0, %c5_i32_53 : i32
    %c2_i32_54 = arith.constant 2 : i32
    %90 = arith.muli %89, %c2_i32_54 : i32
    %c1_i32_55 = arith.constant 1 : i32
    %91 = arith.addi %90, %c1_i32_55 : i32
    %92 = arith.index_cast %91 : i32 to index
    %93 = memref.load %arg2[%92] : memref<16xi32, #tpu.memory_space<smem>>
    %94 = arith.index_cast %93 : i32 to index
    %c0_56 = arith.constant 0 : index
    %95 = vector.load %arg3[%94, %c0_56] : memref<128x16xf32, #tpu.memory_space<vmem>>, vector<1x16xf32>
    %c5_57 = arith.constant 5 : index
    %c16_58 = arith.constant 16 : index
    %96 = vector.load %arg9[%c5_57, %c16_58] : memref<8x32xf32, #tpu.memory_space<vmem>>, vector<1x16xf32>
    tpu.vector_store %arg9[%c5_57, %c16_58], %95 {strides = array<i32>} : memref<8x32xf32, #tpu.memory_space<vmem>>, vector<1x16xf32>,
    %c6_i32 = arith.constant 6 : i32
    %97 = arith.addi %0, %c6_i32 : i32
    %c2_i32_59 = arith.constant 2 : i32
    %98 = arith.muli %97, %c2_i32_59 : i32
    %c0_i32_60 = arith.constant 0 : i32
    %99 = arith.addi %98, %c0_i32_60 : i32
    %100 = arith.index_cast %99 : i32 to index
    %101 = memref.load %arg2[%100] : memref<16xi32, #tpu.memory_space<smem>>
    %102 = arith.index_cast %101 : i32 to index
    %c0_61 = arith.constant 0 : index
    %103 = vector.load %arg3[%102, %c0_61] : memref<128x16xf32, #tpu.memory_space<vmem>>, vector<1x16xf32>
    %c6 = arith.constant 6 : index
    %c0_62 = arith.constant 0 : index
    %104 = vector.load %arg9[%c6, %c0_62] : memref<8x32xf32, #tpu.memory_space<vmem>>, vector<1x16xf32>
    tpu.vector_store %arg9[%c6, %c0_62], %103 {strides = array<i32>} : memref<8x32xf32, #tpu.memory_space<vmem>>, vector<1x16xf32>,
    %c6_i32_63 = arith.constant 6 : i32
    %105 = arith.addi %0, %c6_i32_63 : i32
    %c2_i32_64 = arith.constant 2 : i32
    %106 = arith.muli %105, %c2_i32_64 : i32
    %c1_i32_65 = arith.constant 1 : i32
    %107 = arith.addi %106, %c1_i32_65 : i32
    %108 = arith.index_cast %107 : i32 to index
    %109 = memref.load %arg2[%108] : memref<16xi32, #tpu.memory_space<smem>>
    %110 = arith.index_cast %109 : i32 to index
    %c0_66 = arith.constant 0 : index
    %111 = vector.load %arg3[%110, %c0_66] : memref<128x16xf32, #tpu.memory_space<vmem>>, vector<1x16xf32>
    %c6_67 = arith.constant 6 : index
    %c16_68 = arith.constant 16 : index
    %112 = vector.load %arg9[%c6_67, %c16_68] : memref<8x32xf32, #tpu.memory_space<vmem>>, vector<1x16xf32>
    tpu.vector_store %arg9[%c6_67, %c16_68], %111 {strides = array<i32>} : memref<8x32xf32, #tpu.memory_space<vmem>>, vector<1x16xf32>,
    %c7_i32 = arith.constant 7 : i32
    %113 = arith.addi %0, %c7_i32 : i32
    %c2_i32_69 = arith.constant 2 : i32
    %114 = arith.muli %113, %c2_i32_69 : i32
    %c0_i32_70 = arith.constant 0 : i32
    %115 = arith.addi %114, %c0_i32_70 : i32
    %116 = arith.index_cast %115 : i32 to index
    %117 = memref.load %arg2[%116] : memref<16xi32, #tpu.memory_space<smem>>
    %118 = arith.index_cast %117 : i32 to index
    %c0_71 = arith.constant 0 : index
    %119 = vector.load %arg3[%118, %c0_71] : memref<128x16xf32, #tpu.memory_space<vmem>>, vector<1x16xf32>
    %c7 = arith.constant 7 : index
    %c0_72 = arith.constant 0 : index
    %120 = vector.load %arg9[%c7, %c0_72] : memref<8x32xf32, #tpu.memory_space<vmem>>, vector<1x16xf32>
    tpu.vector_store %arg9[%c7, %c0_72], %119 {strides = array<i32>} : memref<8x32xf32, #tpu.memory_space<vmem>>, vector<1x16xf32>,
    %c7_i32_73 = arith.constant 7 : i32
    %121 = arith.addi %0, %c7_i32_73 : i32
    %c2_i32_74 = arith.constant 2 : i32
    %122 = arith.muli %121, %c2_i32_74 : i32
    %c1_i32_75 = arith.constant 1 : i32
    %123 = arith.addi %122, %c1_i32_75 : i32
    %124 = arith.index_cast %123 : i32 to index
    %125 = memref.load %arg2[%124] : memref<16xi32, #tpu.memory_space<smem>>
    %126 = arith.index_cast %125 : i32 to index
    %c0_76 = arith.constant 0 : index
    %127 = vector.load %arg3[%126, %c0_76] : memref<128x16xf32, #tpu.memory_space<vmem>>, vector<1x16xf32>
    %c7_77 = arith.constant 7 : index
    %c16_78 = arith.constant 16 : index
    %128 = vector.load %arg9[%c7_77, %c16_78] : memref<8x32xf32, #tpu.memory_space<vmem>>, vector<1x16xf32>
    tpu.vector_store %arg9[%c7_77, %c16_78], %127 {strides = array<i32>} : memref<8x32xf32, #tpu.memory_space<vmem>>, vector<1x16xf32>,
    %c0_79 = arith.constant 0 : index
    %c0_80 = arith.constant 0 : index
    %129 = vector.load %arg9[%c0_79, %c0_80] : memref<8x32xf32, #tpu.memory_space<vmem>>, vector<8x32xf32>
    %c0_81 = arith.constant 0 : index
    %c0_82 = arith.constant 0 : index
    %130 = vector.load %arg4[%c0_81, %c0_82] : memref<32x128xf32, #tpu.memory_space<vmem>>, vector<32x128xf32>
    %cst = arith.constant dense<0.000000e+00> : vector<8x128xf32>
    %131 = tpu.matmul %129, %130, %cst {dimension_numbers = #tpu.dot_dimension_numbers<[1], [0], [0], [1], [0, 0, 1, 1], [], []>} : vector<8x32xf32>, vector<32x128xf32>, vector<8x128xf32> -> vector<8x128xf32>
    %c0_83 = arith.constant 0 : index
    %c0_84 = arith.constant 0 : index
    %132 = vector.load %arg5[%c0_83, %c0_84] : memref<1x128xf32, #tpu.memory_space<vmem>>, vector<1x128xf32>
    %133 = vector.broadcast %132 : vector<1x128xf32> to vector<8x128xf32>
    %134 = arith.addf %131, %133 : vector<8x128xf32>
    %cst_85 = arith.constant 0.000000e+00 : f32
    %135 = vector.broadcast %cst_85 : f32 to vector<8x128xf32>
    %136 = arith.maximumf %134, %135 : vector<8x128xf32>
    %c0_86 = arith.constant 0 : index
    %c0_87 = arith.constant 0 : index
    %137 = vector.load %arg6[%c0_86, %c0_87] : memref<128x128xf32, #tpu.memory_space<vmem>>, vector<128x128xf32>
    %cst_88 = arith.constant dense<0.000000e+00> : vector<8x128xf32>
    %138 = tpu.matmul %136, %137, %cst_88 {dimension_numbers = #tpu.dot_dimension_numbers<[1], [0], [0], [1], [0, 0, 1, 1], [], []>} : vector<8x128xf32>, vector<128x128xf32>, vector<8x128xf32> -> vector<8x128xf32>
    %c0_89 = arith.constant 0 : index
    %c0_90 = arith.constant 0 : index
    %139 = vector.load %arg7[%c0_89, %c0_90] : memref<1x128xf32, #tpu.memory_space<vmem>>, vector<1x128xf32>
    %140 = vector.broadcast %139 : vector<1x128xf32> to vector<8x128xf32>
    %141 = arith.addf %138, %140 : vector<8x128xf32>
    %c0_91 = arith.constant 0 : index
    %c0_92 = arith.constant 0 : index
    %142 = vector.load %arg8[%c0_91, %c0_92] : memref<8x128xf32, #tpu.memory_space<vmem>>, vector<8x128xf32>
    tpu.vector_store %arg8[%c0_91, %c0_92], %141 {strides = array<i32>} : memref<8x128xf32, #tpu.memory_space<vmem>>, vector<8x128xf32>,
    return
  }
  func.func @transform_0(%arg0: i32, %arg1: i32) -> i32 {
    %c0_i32 = arith.constant 0 : i32
    %c0_i32_0 = arith.constant 0 : i32
    return %c0_i32 : i32
  }
  func.func @transform_1(%arg0: i32, %arg1: i32) -> (i32, i32) {
    %c0_i32 = arith.constant 0 : i32
    %c0_i32_0 = arith.constant 0 : i32
    %c0_i32_1 = arith.constant 0 : i32
    return %c0_i32, %c0_i32_0 : i32, i32
  }
  func.func @transform_2(%arg0: i32, %arg1: i32) -> (i32, i32) {
    %c0_i32 = arith.constant 0 : i32
    %c0_i32_0 = arith.constant 0 : i32
    %c0_i32_1 = arith.constant 0 : i32
    return %c0_i32, %c0_i32_0 : i32, i32
  }
  func.func @transform_3(%arg0: i32, %arg1: i32) -> (i32, i32) {
    %c0_i32 = arith.constant 0 : i32
    %c0_i32_0 = arith.constant 0 : i32
    %c0_i32_1 = arith.constant 0 : i32
    return %c0_i32, %c0_i32_0 : i32, i32
  }
  func.func @transform_4(%arg0: i32, %arg1: i32) -> (i32, i32) {
    %c0_i32 = arith.constant 0 : i32
    %c0_i32_0 = arith.constant 0 : i32
    return %c0_i32, %arg0 : i32, i32
  }
  func.func @transform_5(%arg0: i32, %arg1: i32) -> (i32, i32) {
    %c0_i32 = arith.constant 0 : i32
    %c0_i32_0 = arith.constant 0 : i32
    return %c0_i32, %arg0 : i32, i32
  }
  func.func @transform_6(%arg0: i32, %arg1: i32) -> (i32, i32) {
    %c0_i32 = arith.constant 0 : i32
    return %arg1, %arg0 : i32, i32
  }
}

</mosaic_0001>

<bundles_post_ra>
// kernel: tpu_custom_call.1
= control target key start
LH: loop header
LB: loop body
LE: loop exit
PB: predicated region body
PF: predicated region fallthrough
CT: control target
= control target key end

     0   :  { %11 = vsyncpa [#allocation6], 0  ;;  %s542_s0 = inlined_call_operand.vmem [shape: s32[16], index: 0, kind: input, shape index: {}]   ;;  %s543_s1 = inlined_call_operand.vmem [shape: f32[128,16], index: 1, kind: input, shape index: {}]   ;;  %s544_s2 = inlined_call_operand.hbm [shape: f32[32,128], index: 2, kind: input, shape index: {}]   ;;  %s545_s3 = inlined_call_operand.vmem [shape: f32[1,128], index: 3, kind: input, shape index: {}]   ;;  %s546_s4 = inlined_call_operand.vmem [shape: f32[128,128], index: 4, kind: input, shape index: {}]   ;;  %s547_s5 = inlined_call_operand.vmem [shape: f32[1,128], index: 5, kind: input, shape index: {}]   ;;  %s548_s6 = inlined_call_operand.hbm [shape: f32[8,128], index: 6, kind: output, shape index: {}]  }
   0x1   :  { %12 = vsyncpa [#allocation4], 0 }
   0x2   :  { %13 = vsyncpa [#allocation5], 0  ;;  %s19_s23 = sshll.u32 %s542_s0, 4  ;;  %s29_s26 = sshll.u32 %s544_s2, 4  ;;  %s20_s23 = int_to_ptr.vmem [resolvable:$true] %s19_s23  ;;  %s30_s26 = int_to_ptr.hbm [resolvable:$true] %s29_s26 }
   0x3   :  { %s374_s27 = smov [#allocation3]   ;;  %s375_s28 = smov [#allocation7]  }
   0x4   :  { %22 = dma.vmem_to_smem %s20_s23, 16, %s374_s27, [#allocation6]  }
   0x5   :  { %s31_s29 = sshll.u32 %s375_s28, 4  ;;  %s376_s30 = smov 128   ;;  %s32_s29 = int_to_ptr.vmem [resolvable:$true] %s31_s29 }
   0x6   :  { %s377_s7 = smov 8  }
   0x7   :  { %37 = dma.hbm_to_vmem [thread:$0]  %s30_s26, 512, %s32_s29, [#allocation4], %s376_s30, %s376_s30, %s377_s7  }
   0x8   :  { %368 = dma.done.wait [#allocation6], 16  }
   0x9   :  { %369 = vsyncadd [#allocation6], 4294967280 }
   0xa   :  { %370 = dma.done.wait [#allocation4], 512  }
   0xb   :  { %371 = vsyncadd [#allocation4], 4294966784 }
   0xc   :  { %52 = sfence }
   0xd   :  { %s288_s0 = sld [smem:[#allocation3 + $0x5]]  ;;  %s378_s17 = smov 16   ;;  %vm58_vm0 = vcmask 122880   ;;  %vm68_vm1 = vcmask 254080   ;;  %v179_v17 = vld [vmem:[#allocation7 + $0x18] sm:$0xff]  ;;  %v178_v18 = vld [vmem:[#allocation7 + $0x10] sm:$0xff] }
   0xe   :  { %s284_s8 = sld [smem:[#allocation3 + $0x1]]  ;;  %200 = vmatpush.msra.mxu0 %v179_v17  ;;  %v177_v19 = vld [vmem:[#allocation7 + $0x8] sm:$0xff]  ;;  %v176_v21 = vld [vmem:[#allocation7] sm:$0xff]  ;;  %v224_v22 = vld [vmem:[%s546_s4 + $0x78] sm:$0xff]  ;;  %vm184_vm2 = vcmask 261120   ;;  %s379_s28 = smov [#allocation8]  }
   0xf   :  { %s290_s9 = sld [smem:[#allocation3 + $0x7]]  ;;  %v223_v23 = vld [vmem:[%s546_s4 + $0x70] sm:$0xff]  ;;  %229 = vmatpush.msra.mxu1 %v224_v22  ;;  %v222_v24 = vld [vmem:[%s546_s4 + $0x68] sm:$0xff]  ;;  %v221_v25 = vld [vmem:[%s546_s4 + $0x60] sm:$0xff] }
  0x10   :  { %s286_s10 = sld [smem:[#allocation3 + $0x3]]  ;;  %201 = vmatpush.msra.mxu0 %v178_v18  ;;  %v220_v27 = vld [vmem:[%s546_s4 + $0x58] sm:$0xff]  ;;  %v219_v29 = vld [vmem:[%s546_s4 + $0x50] sm:$0xff]  ;;  %v218_v30 = vld [vmem:[%s546_s4 + $0x48] sm:$0xff] }
  0x11   :  { %s292_s13 = sld [smem:[#allocation3 + $0x9]]  ;;  %230 = vmatpush.msra.mxu1 %v223_v23  ;;  %v217_v31 = vld [vmem:[%s546_s4 + $0x40] sm:$0xff]  ;;  %v216_v33 = vld [vmem:[%s546_s4 + $0x38] sm:$0xff]  ;;  %v215_v35 = vld [vmem:[%s546_s4 + $0x30] sm:$0xff] }
  0x12   :  { %s294_s18 = sld [smem:[#allocation3 + $0xb]]  ;;  %202 = vmatpush.msra.mxu0 %v177_v19  ;;  %v214_v36 = vld [vmem:[%s546_s4 + $0x28] sm:$0xff]  ;;  %v213_v37 = vld [vmem:[%s546_s4 + $0x20] sm:$0xff]  ;;  %v212_v39 = vld [vmem:[%s546_s4 + $0x18] sm:$0xff] }
  0x13   :  { %s93_s12 = scalar_lea.vmem %s543_s1, %s288_s0  ;;  %s298_s22 = sld [smem:[#allocation3 + $0xf]]  ;;  %231 = vmatpush.msra.mxu1 %v222_v24  ;;  %v211_v42 = vld [vmem:[%s546_s4 + $0x10] sm:$0xff]  ;;  %v210_v43 = vld [vmem:[%s546_s4 + $0x8] sm:$0xff]  ;;  %v209_v44 = vld [vmem:[%s546_s4] sm:$0xff] }
  0x14   :  { %v94_v0 = vld [vmem:[%s93_s12] sm:$0x1]  ;;  %s62_s16 = scalar_lea.vmem %s543_s1, %s284_s8  ;;  %s296_s26 = sld [smem:[#allocation3 + $0xd]]  ;;  %203 = vmatpush.msra.mxu0 %v176_v21 }
  0x15   :  { %96 = vrot.lane.b32.xlu1 %v94_v0, %s378_s17  ;;  %v63_v1 = vld [vmem:[%s62_s16] sm:$0x1]  ;;  %s108_s21 = scalar_lea.vmem %s543_s1, %s290_s9  ;;  %s55_s14 = sld [smem:[#allocation3]]  ;;  %232 = vmatpush.msra.mxu1 %v221_v25 }
  0x16   :  { %65 = vrot.lane.b32.xlu0 %v63_v1, %s378_s17  ;;  %s78_s25 = scalar_lea.vmem %s543_s1, %s286_s10  ;;  %v109_v2 = vld [vmem:[%s108_s21] sm:$0x1]  ;;  %s291_s15 = sld [smem:[#allocation3 + $0x8]] }
  0x17   :  { %s123_s29 = scalar_lea.vmem %s543_s1, %s292_s13  ;;  %v79_v4 = vld [vmem:[%s78_s25] sm:$0x1]  ;;  %s287_s13 = sld [smem:[#allocation3 + $0x4]]  ;;  %233 = vmatpush.msra.mxu1 %v220_v27 }
  0x18   :  { %v124_v3 = vld [vmem:[%s123_s29] sm:$0x1]  ;;  %s138_s0 = scalar_lea.vmem %s543_s1, %s294_s18  ;;  %s289_s16 = sld [smem:[#allocation3 + $0x6]] }
  0x19   :  { %126 = vrot.lane.b32.xlu2 %v124_v3, %s378_s17  ;;  %s168_s11 = scalar_lea.vmem %s543_s1, %s298_s22  ;;  %v139_v5 = vld [vmem:[%s138_s0] sm:$0x1]  ;;  %s285_s21 = sld [smem:[#allocation3 + $0x2]]  ;;  %234 = vmatpush.msra.mxu1 %v219_v29 }
  0x1a   :  { %s153_s12 = scalar_lea.vmem %s543_s1, %s296_s26  ;;  %v169_v6 = vld [vmem:[%s168_s11] sm:$0x1]  ;;  %s293_s25 = sld [smem:[#allocation3 + $0xa]] }
  0x1b   :  { %v154_v7 = vld [vmem:[%s153_s12] sm:$0x1]  ;;  %s56_s24 = scalar_lea.vmem %s543_s1, %s55_s14  ;;  %s297_s26 = sld [smem:[#allocation3 + $0xe]]  ;;  %235 = vmatpush.msra.mxu1 %v218_v30 }
  0x1c   :  { %v57_v9 = vld [vmem:[%s56_s24] sm:$0x1]  ;;  %s295_s11 = sld [smem:[#allocation3 + $0xc]] }
  0x1d   :  { %111 = vrot.lane.b32.xlu1 %v109_v2, %s378_s17  ;;  %s88_s20 = scalar_lea.vmem %s543_s1, %s287_s13  ;;  %59 = vst.msk [vmem:[#allocation2] sm:$0x1] %vm58_vm0, %v57_v9  ;;  %236 = vmatpush.msra.mxu1 %v217_v31  ;;  %v306_v45 = vld [vmem:[%s545_s3] ss:$0 sm:$0xff] }
  0x1e   :  { %81 = vrot.lane.b32.xlu0 %v79_v4, %s378_s17  ;;  %v89_v8 = vld [vmem:[%s88_s20] sm:$0x1]  ;;  %s103_s7 = scalar_lea.vmem %s543_s1, %s289_s16 }
  0x1f   :  { %90 = vst.msk [vmem:[#allocation2 + $0x2] sm:$0x1] %vm58_vm0, %v89_v8  ;;  %v104_v11 = vld [vmem:[%s103_s7] sm:$0x1]  ;;  %s73_s9 = scalar_lea.vmem %s543_s1, %s285_s21  ;;  %237 = vmatpush.msra.mxu1 %v216_v33  ;;  %s257_s7 = sshll.u32 %s548_s6, 4  ;;  %s258_s7 = int_to_ptr.hbm [resolvable:$true] %s257_s7 }
  0x20   :  { %105 = vst.msk [vmem:[#allocation2 + $0x3] sm:$0x1] %vm58_vm0, %v104_v11  ;;  %s133_s12 = scalar_lea.vmem %s543_s1, %s293_s25  ;;  %v74_v12 = vld [vmem:[%s73_s9] sm:$0x1] }
  0x21   :  { %141 = vrot.lane.b32.xlu2 %v139_v5, %s378_s17  ;;  %75 = vst.msk [vmem:[#allocation2 + $0x1] sm:$0x1] %vm58_vm0, %v74_v12  ;;  %v134_v13 = vld [vmem:[%s133_s12] sm:$0x1]  ;;  %238 = vmatpush.msra.mxu1 %v215_v35 }
  0x22   :  { %135 = vst.msk [vmem:[#allocation2 + $0x5] sm:$0x1] %vm58_vm0, %v134_v13  ;;  %s148_s19 = scalar_lea.vmem %s543_s1, %s295_s11  ;;  %v307_v49 = vld [vmem:[%s547_s5] ss:$0 sm:$0xff] }
  0x23   :  { %v149_v16 = vld [vmem:[%s148_s19] sm:$0x1]  ;;  %239 = vmatpush.msra.mxu1 %v214_v36 }
  0x24   :  { %150 = vst.msk [vmem:[#allocation2 + $0x6] sm:$0x1] %vm58_vm0, %v149_v16 }
  0x25   :  { %171 = vrot.lane.b32.xlu1 %v169_v6, %s378_s17  ;;  %240 = vmatpush.msra.mxu1 %v213_v37 }
  0x26   :  { %156 = vrot.lane.b32.xlu0 %v154_v7, %s378_s17  ;;  %s118_s17 = scalar_lea.vmem %s543_s1, %s291_s15  ;;  %s163_s15 = scalar_lea.vmem %s543_s1, %s297_s26 }
  0x27   :  { %v119_v10 = vld [vmem:[%s118_s17] sm:$0x1]  ;;  %241 = vmatpush.msra.mxu1 %v212_v39  ;;  %s255_s17 = sshll.u32 %s379_s28, 4  ;;  %s256_s17 = int_to_ptr.vmem [resolvable:$true] %s255_s17 }
  0x28   :  { %120 = vst.msk [vmem:[#allocation2 + $0x4] sm:$0x1] %vm58_vm0, %v119_v10  ;;  %v164_v14 = vld [vmem:[%s163_s15] sm:$0x1] }
  0x29   :  { %165 = vst.msk [vmem:[#allocation2 + $0x7] sm:$0x1] %vm58_vm0, %v164_v14  ;;  %242 = vmatpush.msra.mxu1 %v211_v42 }
  0x2b   :  { %243 = vmatpush.msra.mxu1 %v210_v43 }
  0x2d   :  { %244 = vmatpush.msra.mxu1 %v209_v44 }
  0x73   :  { %v127_v15 = vpop.permute.xlu2 %126 }
  0x74   :  { %129 = vst.msk [vmem:[#allocation2 + $0x4] sm:$0x1] %vm68_vm1, %v127_v15 }
  0x7b   :  { %v142_v20 = vpop.permute.xlu2 %141 }
  0x7c   :  { %144 = vst.msk [vmem:[#allocation2 + $0x5] sm:$0x1] %vm68_vm1, %v142_v20 }
  0x87   :  { %v97_v26 = vpop.permute.xlu1 %96 }
  0x88   :  { %99 = vst.msk [vmem:[#allocation2 + $0x2] sm:$0x1] %vm68_vm1, %v97_v26  ;;  %v66_v28 = vpop.permute.xlu0 %65 }
  0x89   :  { %69 = vst.msk [vmem:[#allocation2] sm:$0x1] %vm68_vm1, %v66_v28 }
  0x8f   :  { %v112_v32 = vpop.permute.xlu1 %111 }
  0x90   :  { %114 = vst.msk [vmem:[#allocation2 + $0x3] sm:$0x1] %vm68_vm1, %v112_v32  ;;  %v82_v34 = vpop.permute.xlu0 %81 }
  0x91   :  { %84 = vst.msk [vmem:[#allocation2 + $0x1] sm:$0x1] %vm68_vm1, %v82_v34 }
  0x97   :  { %v172_v38 = vpop.permute.xlu1 %171 }
  0x98   :  { %174 = vst.msk [vmem:[#allocation2 + $0x7] sm:$0x1] %vm68_vm1, %v172_v38  ;;  %v157_v40 = vpop.permute.xlu0 %156 }
  0x99   :  { %159 = vst.msk [vmem:[#allocation2 + $0x6] sm:$0x1] %vm68_vm1, %v157_v40 }
  0xa0   :  { %v175_v41 = vld [vmem:[#allocation2] sm:$0xff] }
  0xa1   :  { %299 = vmatmul.msk.f32.vlgmr.msra.gmra.mxu0 %vm184_vm2, %v175_v41 }
 0x11e   :  { %v205_v46 = vpop.f32.mrf.mxu0 }
 0x11f   :  { %v206_v47 = vadd.f32 %v306_v45, %v205_v46 }
 0x121   :  { %v208_v48 = vmax.f32 %v206_v47, 0.0 }
 0x123   :  { %245 = vmatmul.f32.vlgmr.msra.gmra.mxu1 %v208_v48 }
 0x1a0   :  { %v246_v50 = vpop.f32.mrf.mxu1 }
 0x1a1   :  { %v247_v51 = vadd.f32 %v307_v49, %v246_v50 }
 0x1a3   :  { %249 = vst [vmem:[#allocation8] sm:$0xff] %v247_v51 }
 0x1a4   :  { %260 = dma.vmem_to_hbm [thread:$0]  %s256_s17, 128, %s258_s7, [#allocation5]  }
 0x1a5   :  { %372 = dma.done.wait [#allocation5], 128  }
 0x1a6   :  { %373 = vsyncadd [#allocation5], 4294967168 }
 0x1a7   :  { %265 = vsyncpa [#allocation4], 1 }
 0x1a8   :  { %266 = vsyncpa [#allocation5], 1 }
 0x1a9   :  { %267 = vsyncpa [#allocation6], 1 }

</bundles_post_ra>
